<compile_context>
chip_gen: v6e
topology: v6e:2x2x1
jax: 0.10.0
libtpu: 0.0.40
codegen_flags: <defaults>
</compile_context>

<pallas_src>
import jax
import jax.numpy as jnp
from jax.experimental import pallas as pl
from jax.experimental.pallas import tpu as pltpu

_LANE = 128                     # vreg lane width
_BLOCK_TARGET_BYTES = 4 << 20   # ~4 MiB per streaming block
_VMEM_LIMIT_BYTES = 32 << 20    # safe scoped-VMEM limit on v5e/v6e/v7x


def _min_sublane(dtype) -> int:
    """Packed min-tile rows: 8 for 32-bit, 16 for 16-bit, 32 for 8-bit dtypes."""
    itemsize = jnp.dtype(dtype).itemsize
    if itemsize >= 4:
        return 8
    return 8 * (4 // itemsize)


def _max_block_rows(dtype) -> int:
    """Rows of a ~4 MiB (rows, 128) streaming block, rounded to the packed min-tile."""
    ms = _min_sublane(dtype)
    rows = _BLOCK_TARGET_BYTES // (_LANE * jnp.dtype(dtype).itemsize)
    return max(ms, (rows // ms) * ms)


def _copy_kernel(x_ref, o_ref):
    # Pure pass-through; the only work is the DMA pipeline around it.
    o_ref[...] = x_ref[...]


def _copy2_kernel(x_ref, y_ref, ox_ref, oy_ref):
    ox_ref[...] = x_ref[...]
    oy_ref[...] = y_ref[...]


def _lane_dense_2d(a):
    """Free reshape to a lane-dense (rows, 128) view, or None if size % 128 != 0."""
    if a.size == 0 or a.size % _LANE != 0:
        return None
    return a.reshape(a.size // _LANE, _LANE)


def _identity_tiled(a):
    """Single-array pass-through, streamed in lane-dense (block_rows, 128) tiles."""
    if a.size == 0:
        return a  # nothing to move; avoid a zero-sized grid

    a2d = _lane_dense_2d(a)
    if a2d is None:
        # Ragged total size (not a multiple of 128): move the whole array as one
        # full-extent block (block_shape == full array dims is always legal); no
        # pre-padding or trailing slice is needed.
        arr = a.reshape(1, a.size) if a.ndim < 2 else a
        out = pl.pallas_call(
            _copy_kernel,
            out_shape=jax.ShapeDtypeStruct(arr.shape, arr.dtype),
            input_output_aliases={0: 0},
            compiler_params=pltpu.CompilerParams(
                vmem_limit_bytes=_VMEM_LIMIT_BYTES),
        )(arr)
        return out.reshape(a.shape)

    rows = a2d.shape[0]
    block_rows = min(rows, _max_block_rows(a.dtype))
    # block is either the full extent (rows <= max) or a min-sublane multiple;
    # the final partial block (rows % block_rows != 0) is masked by Pallas.
    grid_rows = pl.cdiv(rows, block_rows)

    out2d = pl.pallas_call(
        _copy_kernel,
        out_shape=jax.ShapeDtypeStruct(a2d.shape, a2d.dtype),
        grid=(grid_rows,),
        in_specs=[pl.BlockSpec((block_rows, _LANE), lambda i: (i, 0))],
        out_specs=pl.BlockSpec((block_rows, _LANE), lambda i: (i, 0)),
        input_output_aliases={0: 0},
        compiler_params=pltpu.CompilerParams(
            dimension_semantics=("parallel",),   # v7x: shard blocks across 2 TCs
            vmem_limit_bytes=_VMEM_LIMIT_BYTES,
        ),
    )(a2d)
    return out2d.reshape(a.shape)


def _can_fuse(x, y) -> bool:
    """Both arrays lane-dense and small enough for a single full-extent block each."""
    if x.size == 0 or y.size == 0:
        return False
    if x.size % _LANE != 0 or y.size % _LANE != 0:
        return False
    return (x.size // _LANE <= _max_block_rows(x.dtype)
            and y.size // _LANE <= _max_block_rows(y.dtype))


def _identity_fused(x, y):
    """One pallas_call carrying both arrays (halves fixed dispatch overhead)."""
    x2d = _lane_dense_2d(x)
    y2d = _lane_dense_2d(y)
    ox, oy = pl.pallas_call(
        _copy2_kernel,
        out_shape=(jax.ShapeDtypeStruct(x2d.shape, x2d.dtype),
                   jax.ShapeDtypeStruct(y2d.shape, y2d.dtype)),
        input_output_aliases={0: 0, 1: 1},
        compiler_params=pltpu.CompilerParams(
            vmem_limit_bytes=_VMEM_LIMIT_BYTES),
    )(x2d, y2d)
    return ox.reshape(x.shape), oy.reshape(y.shape)


@jax.jit
def identity_two(x, y):
    """Pallas equivalent of IdentityTwo.forward: returns (x, y) unchanged."""
    if _can_fuse(x, y):
        return _identity_fused(x, y)
    return _identity_tiled(x), _identity_tiled(y)


if __name__ == "__main__":
    key = jax.random.PRNGKey(0)
    kx, ky = jax.random.split(key)

    # Small deterministic inputs consistent with a generic (x, y) forward.
    x = jax.random.normal(kx, (2, 4, 16, 16), dtype=jnp.float32)  # batch=2, ch=4, spatial=16
    y = jax.random.normal(ky, (2, 8, 32), dtype=jnp.float32)      # batch=2, seq=8, hidden=32

    out_x, out_y = identity_two(x, y)
    out_x = jax.block_until_ready(out_x)
    out_y = jax.block_until_ready(out_y)

    assert out_x.shape == x.shape and out_x.dtype == x.dtype
    assert out_y.shape == y.shape and out_y.dtype == y.dtype
    assert jnp.array_equal(out_x, x)
    assert jnp.array_equal(out_y, y)
    print("KERNEL_OK")
</pallas_src>

<mosaic_0001>
module attributes {stable_mosaic.version = 11 : i64} {
  func.func @_copy2_kernel(%arg0: memref<16x128xf32, #tpu.memory_space<vmem>>, %arg1: memref<4x128xf32, #tpu.memory_space<vmem>>, %arg2: memref<16x128xf32, #tpu.memory_space<vmem>>, %arg3: memref<4x128xf32, #tpu.memory_space<vmem>>) attributes {dimension_semantics = [], scalar_prefetch = 0 : i64, scratch_operands = 0 : i64, tpu.core_type = #tpu.core_type<tc>} {
    %c0 = arith.constant 0 : index
    %c0_0 = arith.constant 0 : index
    %0 = vector.load %arg0[%c0, %c0_0] : memref<16x128xf32, #tpu.memory_space<vmem>>, vector<16x128xf32>
    %c0_1 = arith.constant 0 : index
    %c0_2 = arith.constant 0 : index
    %1 = vector.load %arg2[%c0_1, %c0_2] : memref<16x128xf32, #tpu.memory_space<vmem>>, vector<16x128xf32>
    tpu.vector_store %arg2[%c0_1, %c0_2], %0 {strides = array<i32>} : memref<16x128xf32, #tpu.memory_space<vmem>>, vector<16x128xf32>,
    %c0_3 = arith.constant 0 : index
    %c0_4 = arith.constant 0 : index
    %2 = vector.load %arg1[%c0_3, %c0_4] : memref<4x128xf32, #tpu.memory_space<vmem>>, vector<4x128xf32>
    %c0_5 = arith.constant 0 : index
    %c0_6 = arith.constant 0 : index
    %3 = vector.load %arg3[%c0_5, %c0_6] : memref<4x128xf32, #tpu.memory_space<vmem>>, vector<4x128xf32>
    tpu.vector_store %arg3[%c0_5, %c0_6], %2 {strides = array<i32>} : memref<4x128xf32, #tpu.memory_space<vmem>>, vector<4x128xf32>,
    return
  }
}

</mosaic_0001>

<bundles_post_ra>
// kernel: identity_two.1
= control target key start
LH: loop header
LB: loop body
LE: loop exit
PB: predicated region body
PF: predicated region fallthrough
CT: control target
= control target key end

     0   :  { %s65_s0 = inlined_call_operand.vmem [shape: f32[16,128], index: 0, kind: input, shape index: {}, may-alias: {0,2}]   ;;  %s66_s2 = inlined_call_operand.vmem [shape: f32[16,128], index: 2, kind: output, shape index: {0}, may-alias: {0,2}]   ;;  %s67_s1 = inlined_call_operand.vmem [shape: f32[4,128], index: 1, kind: input, shape index: {}, may-alias: {1,3}]   ;;  %s68_s3 = inlined_call_operand.vmem [shape: f32[4,128], index: 3, kind: output, shape index: {1}, may-alias: {1,3}]  }
   0x1   :  { %v13_v0 = vld [vmem:[%s65_s0] sm:$0xff]  ;;  %v14_v1 = vld [vmem:[%s65_s0 + $0x8] sm:$0xff] }
   0x2   :  { %v17_v2 = vld [vmem:[%s67_s1] sm:$0xf]  ;;  %15 = vst [vmem:[%s66_s2] sm:$0xff] %v13_v0  ;;  %16 = vst [vmem:[%s66_s2 + $0x8] sm:$0xff] %v14_v1 }
   0x3   :  { %18 = vst [vmem:[%s68_s3] sm:$0xf] %v17_v2 }

</bundles_post_ra>
